<compile_context>
chip_gen: v7x
topology: tpu7x:2x2x1
jax: 0.10.0
libtpu: 0.0.40
codegen_flags: <defaults>
</compile_context>

<pallas_src>
import functools
import itertools

import numpy as np
import jax
import jax.numpy as jnp
from jax import lax
from jax.experimental import pallas as pl
from jax.experimental.pallas import tpu as pltpu


_MAX_BLOCK_BYTES = 1 << 20          # ~1 MiB per array per block (all TPU gens)
_DEFAULT_RESIDENT_MAX = 4 * 2**20   # whole-state-in-VMEM path threshold


# ------------------------------ helpers ----------------------------------- #
def _pick_row_tile(rows, cap):
    """Largest row tile <= cap that is a divisor of `rows` and a multiple of 8,
    or `rows` itself (full dim is always a legal block extent)."""
    cap = max(1, int(cap))
    if rows <= cap:
        return rows
    start = cap - (cap % 8)
    for t in range(start, 7, -8):
        if rows % t == 0:
            return t
    return rows


def _block_spec(shape, index_map, n_buffers=2):
    """BlockSpec with optional deeper multi-buffering (safe fallback)."""
    if n_buffers > 2 and hasattr(pl, "Buffered"):
        try:
            return pl.BlockSpec(shape, index_map, pipeline_mode=pl.Buffered(n_buffers))
        except TypeError:
            pass
    return pl.BlockSpec(shape, index_map)


def _make_chunk_perm(dim, b, control, target, inverse):
    """Closed-form chunk-level gather map (scalar arithmetic, used in index_maps).

    Chunks are contiguous groups of dim**(wires-1-b) state rows (b = max(c,t));
    out chunk k reads in chunk perm(k)."""
    p_c = dim ** (b - control)
    p_t = dim ** (b - target)

    def src_chunk(k):
        d_c = (k // p_c) % dim
        d_t = (k // p_t) % dim
        if inverse:
            new_t = (d_t + d_c) % dim
        else:
            new_t = (d_t + (dim - d_c)) % dim
        return k + (new_t - d_t) * p_t

    return src_chunk


def _copy_block_kernel(x_ref, o_ref):
    # The gather happens in the input BlockSpec index_map; the body is a pure
    # VMEM copy of one lane/sublane-dense tile.
    o_ref[...] = x_ref[...]


# --------------------- path A: whole state resident in VMEM ---------------- #
def _cnot_resident(x2, *, dim, wires, control, target, inverse, cost):
    """Single-grid-step kernel: state fits in VMEM; gather done with dim^2
    static rectangular slice copies over the (control-digit, target-digit)
    decomposition.  Exactly one HBM read + one HBM write of the state."""
    D, B2 = x2.shape
    a, b = min(control, target), max(control, target)
    A = dim ** a
    M = dim ** (b - a - 1)
    K = (dim ** (wires - 1 - b)) * B2
    control_first = control < target  # axis 1 = digit a, axis 3 = digit b

    x5 = x2.reshape(A, dim, M, dim, K)

    def kernel(x_ref, o_ref):
        for c in range(dim):
            for t in range(dim):
                s = (t + c) % dim if inverse else (t - c) % dim
                if control_first:
                    o_ref[:, c:c + 1, :, t:t + 1, :] = x_ref[:, c:c + 1, :, s:s + 1, :]
                else:
                    o_ref[:, t:t + 1, :, c:c + 1, :] = x_ref[:, s:s + 1, :, c:c + 1, :]

    spec = pl.BlockSpec((A, dim, M, dim, K), lambda i: (0, 0, 0, 0, 0))
    vmem_limit = int(min(64 * 2**20, max(16 * 2**20, 8 * D * B2 * 4)))
    y5 = pl.pallas_call(
        kernel,
        out_shape=jax.ShapeDtypeStruct((A, dim, M, dim, K), jnp.float32),
        grid=(1,),
        in_specs=[spec],
        out_specs=spec,
        cost_estimate=cost,
        compiler_params=pltpu.CompilerParams(
            dimension_semantics=("arbitrary",),
            vmem_limit_bytes=vmem_limit,
        ),
    )(x5)
    return y5.reshape(D, B2)


# ---------------------- path B: streaming chunk gather --------------------- #
def _cnot_tiled(x2, *, dim, wires, control, target, inverse, row_tile_cap, cost):
    D, B2 = x2.shape
    b = max(control, target)
    S = dim ** (wires - 1 - b)     # contiguous state rows per chunk
    n_chunks = dim ** (b + 1)
    src_chunk = _make_chunk_perm(dim, b, control, target, inverse)

    # --- T1: gather directly on the (D, 2B) array (no wrapper reshape) ----- #
    if S % 8 == 0 and B2 % 128 == 0 and 8 * B2 * 4 <= _MAX_BLOCK_BYTES:
        cap_rows = max(8, min(row_tile_cap, _MAX_BLOCK_BYTES // (B2 * 4)))
        TS = _pick_row_tile(S, cap_rows)            # multiple of 8, divides S
        bpc = S // TS                               # row-blocks per chunk
        n_steps = n_chunks * bpc
        n_buf = 3 if n_steps >= 4 else 2

        in_spec = _block_spec((TS, B2), lambda k, r: (src_chunk(k) * bpc + r, 0), n_buf)
        out_spec = _block_spec((TS, B2), lambda k, r: (k * bpc + r, 0), n_buf)
        block_bytes = TS * B2 * 4
        vmem_limit = int(min(48 * 2**20, max(16 * 2**20, 4 * n_buf * block_bytes)))

        return pl.pallas_call(
            _copy_block_kernel,
            out_shape=jax.ShapeDtypeStruct((D, B2), jnp.float32),
            grid=(n_chunks, bpc),
            in_specs=[in_spec],
            out_specs=out_spec,
            cost_estimate=cost,
            compiler_params=pltpu.CompilerParams(
                dimension_semantics=("parallel", "parallel"),
                vmem_limit_bytes=vmem_limit,
            ),
        )(x2)

    # --- T2: reshape each chunk into lane/sublane-dense (R, C) slabs ------- #
    W2 = S * B2                     # float32 elements per chunk
    C = 128 if W2 % 128 == 0 else W2
    R = W2 // C
    cap_rows = max(1, min(row_tile_cap, max(1, _MAX_BLOCK_BYTES // (C * 4))))
    TR = _pick_row_tile(R, cap_rows)
    n_wtiles = R // TR
    n_buf = 3 if n_wtiles >= 2 else 2

    x3 = x2.reshape(n_chunks, R, C)
    in_spec = _block_spec((1, TR, C), lambda k, j: (src_chunk(k), j, 0), n_buf)
    out_spec = _block_spec((1, TR, C), lambda k, j: (k, j, 0), n_buf)
    block_bytes = TR * C * 4
    vmem_limit = int(min(48 * 2**20, max(16 * 2**20, 4 * n_buf * block_bytes)))

    y3 = pl.pallas_call(
        _copy_block_kernel,
        out_shape=jax.ShapeDtypeStruct((n_chunks, R, C), jnp.float32),
        grid=(n_chunks, n_wtiles),
        in_specs=[in_spec],
        out_specs=out_spec,
        cost_estimate=cost,
        compiler_params=pltpu.CompilerParams(
            dimension_semantics=("parallel", "parallel"),
            vmem_limit_bytes=vmem_limit,
        ),
    )(x3)
    return y3.reshape(D, B2)


# ------------------------------ public apply ------------------------------- #
@functools.partial(
    jax.jit,
    static_argnames=("dim", "wires", "control", "target", "inverse",
                     "row_tile_cap", "resident_max_bytes"))
def cnot_apply_pallas(x, *, dim, wires, control, target, inverse=False,
                      row_tile_cap=2048, resident_max_bytes=_DEFAULT_RESIDENT_MAX):
    """out = U_cnot @ x for a (D, B) complex64 state, D = dim**wires."""
    D, B = x.shape
    if D != dim ** wires:
        raise ValueError(f"state has {D} rows, expected dim**wires = {dim ** wires}")
    x = x.astype(jnp.complex64)
    B2 = 2 * B

    # One fused conversion pass: complex64 (D,B) -> float32 (D, 2B) = [re | im].
    x2 = jnp.concatenate([jnp.real(x), jnp.imag(x)], axis=1)

    state_bytes = D * B2 * 4
    cost = pl.CostEstimate(flops=0, transcendentals=0,
                           bytes_accessed=2 * state_bytes)

    if state_bytes <= resident_max_bytes:
        y2 = _cnot_resident(x2, dim=dim, wires=wires, control=control,
                            target=target, inverse=inverse, cost=cost)
    else:
        y2 = _cnot_tiled(x2, dim=dim, wires=wires, control=control,
                         target=target, inverse=inverse,
                         row_tile_cap=row_tile_cap, cost=cost)

    # One fused conversion pass back to complex64.
    return lax.complex(y2[:, :B], y2[:, B:])


class CNOTPallas:
    """JAX/Pallas counterpart of quforge.CNOT (forward only)."""

    def __init__(self, index=(0, 1), wires=2, dim=2, inverse=False,
                 row_tile_cap=2048, resident_max_bytes=_DEFAULT_RESIDENT_MAX):
        control, target = index
        assert control != target and 0 <= control < wires and 0 <= target < wires
        self.control = int(control)
        self.target = int(target)
        self.wires = int(wires)
        self.dim = int(dim)
        self.inverse = bool(inverse)
        self.row_tile_cap = int(row_tile_cap)
        self.resident_max_bytes = int(resident_max_bytes)

    def __call__(self, x):
        x = jnp.asarray(x)
        squeeze = (x.ndim == 1)
        if squeeze:
            x = x[:, None]
        y = cnot_apply_pallas(
            x, dim=self.dim, wires=self.wires, control=self.control,
            target=self.target, inverse=self.inverse,
            row_tile_cap=self.row_tile_cap,
            resident_max_bytes=self.resident_max_bytes)
        return y[:, 0] if squeeze else y


# ----------------------- reference (torch-equivalent) ---------------------- #
def build_cnot_unitary_reference(index, wires, dim, inverse=False):
    """Dense reference U built exactly like the torch module (for validation)."""
    L = np.array(list(itertools.product(range(dim), repeat=wires)))
    l2ns = L.copy()
    l2ns[:, index[1]] = (l2ns[:, index[0]] + l2ns[:, index[1]]) % dim
    eq = np.all(L[:, None, :] == l2ns[None, :, :], axis=2)
    U = np.where(eq, 1.0 + 0.0j, 0.0 + 0.0j).astype(np.complex64)
    if inverse:
        U = np.conj(U).T
    return U


# --------------------------------- demo ----------------------------------- #
if __name__ == "__main__":
    key = jax.random.PRNGKey(0)

    def make_state(k, D, B):
        kr, ki = jax.random.split(k)
        xr = jax.random.normal(kr, (D, B), dtype=jnp.float32)
        xi = jax.random.normal(ki, (D, B), dtype=jnp.float32)
        x = (xr + 1j * xi).astype(jnp.complex64)
        return x / jnp.linalg.norm(x, axis=0, keepdims=True)

    configs = [
        # whole-state-resident (small-state / small-chunk) path
        dict(dim=2, wires=3, index=(0, 1), inverse=False, batch=4),
        dict(dim=3, wires=2, index=(1, 0), inverse=False, batch=2),
        dict(dim=2, wires=2, index=(0, 1), inverse=True,  batch=2),
        # streaming paths (force off the resident path with resident_max_bytes=0)
        dict(dim=2, wires=6, index=(0, 1), inverse=False, batch=64,
             resident_max_bytes=0),                    # T1: direct row-block gather
        dict(dim=2, wires=5, index=(2, 3), inverse=True,  batch=64,
             resident_max_bytes=0),                    # T2: (R,128)-dense chunk slabs
        dict(dim=3, wires=3, index=(2, 0), inverse=False, batch=2,
             resident_max_bytes=0),                    # T2 narrow fallback, control>target
        dict(dim=2, wires=8, index=(5, 6), inverse=False, batch=512,
             resident_max_bytes=0, row_tile_cap=8),    # width tiling + Buffered(3)
    ]
    for cfg in configs:
        D = cfg["dim"] ** cfg["wires"]
        key, sub = jax.random.split(key)
        x = make_state(sub, D, cfg["batch"])
        gate = CNOTPallas(index=cfg["index"], wires=cfg["wires"], dim=cfg["dim"],
                          inverse=cfg["inverse"],
                          row_tile_cap=cfg.get("row_tile_cap", 2048),
                          resident_max_bytes=cfg.get("resident_max_bytes",
                                                     _DEFAULT_RESIDENT_MAX))
        y = jax.block_until_ready(gate(x))
        U_ref = build_cnot_unitary_reference(cfg["index"], cfg["wires"],
                                             cfg["dim"], cfg["inverse"])
        ref = U_ref @ np.asarray(x)
        np.testing.assert_allclose(np.asarray(y), ref, rtol=1e-6, atol=1e-6)
        assert y.shape == (D, cfg["batch"]) and y.dtype == jnp.complex64

    # 1-D state-vector path
    key, sub = jax.random.split(key)
    gate = CNOTPallas(index=(0, 1), wires=3, dim=2)
    x1 = make_state(sub, 8, 1)[:, 0]
    y1 = jax.block_until_ready(gate(x1))
    U_ref = build_cnot_unitary_reference((0, 1), 3, 2)
    np.testing.assert_allclose(np.asarray(y1), U_ref @ np.asarray(x1),
                               rtol=1e-6, atol=1e-6)
    assert y1.shape == (8,) and y1.dtype == jnp.complex64

    print("KERNEL_OK")
</pallas_src>

<mosaic_0001>
module attributes {stable_mosaic.version = 11 : i64} {
  func.func @kernel(%arg0: i32, %arg1: memref<1x2x1x2x16xf32, #tpu.memory_space<vmem>>, %arg2: memref<1x2x1x2x16xf32, #tpu.memory_space<vmem>>) attributes {dimension_semantics = [#tpu.dimension_semantics<arbitrary>], iteration_bounds = array<i64: 1>, scalar_prefetch = 0 : i64, scratch_operands = 0 : i64, tpu.core_type = #tpu.core_type<tc>, window_params = [{pipeline_mode = #tpu.pipeline_mode<synchronous>, transform_indices = @transform_0, window_bounds = array<i64: 1, 2, 1, 2, 16>}, {pipeline_mode = #tpu.pipeline_mode<synchronous>, transform_indices = @transform_1, window_bounds = array<i64: 1, 2, 1, 2, 16>}]} {
    %c0 = arith.constant 0 : index
    %c0_0 = arith.constant 0 : index
    %c0_1 = arith.constant 0 : index
    %c0_2 = arith.constant 0 : index
    %c0_3 = arith.constant 0 : index
    %0 = vector.load %arg1[%c0, %c0_0, %c0_1, %c0_2, %c0_3] : memref<1x2x1x2x16xf32, #tpu.memory_space<vmem>>, vector<1x1x1x1x16xf32>
    %c0_4 = arith.constant 0 : index
    %c0_5 = arith.constant 0 : index
    %c0_6 = arith.constant 0 : index
    %c0_7 = arith.constant 0 : index
    %c0_8 = arith.constant 0 : index
    %1 = vector.load %arg2[%c0_4, %c0_5, %c0_6, %c0_7, %c0_8] : memref<1x2x1x2x16xf32, #tpu.memory_space<vmem>>, vector<1x1x1x1x16xf32>
    tpu.vector_store %arg2[%c0_4, %c0_5, %c0_6, %c0_7, %c0_8], %0 {strides = array<i32>} : memref<1x2x1x2x16xf32, #tpu.memory_space<vmem>>, vector<1x1x1x1x16xf32>,
    %c0_9 = arith.constant 0 : index
    %c0_10 = arith.constant 0 : index
    %c0_11 = arith.constant 0 : index
    %c1 = arith.constant 1 : index
    %c0_12 = arith.constant 0 : index
    %2 = vector.load %arg1[%c0_9, %c0_10, %c0_11, %c1, %c0_12] : memref<1x2x1x2x16xf32, #tpu.memory_space<vmem>>, vector<1x1x1x1x16xf32>
    %c0_13 = arith.constant 0 : index
    %c0_14 = arith.constant 0 : index
    %c0_15 = arith.constant 0 : index
    %c1_16 = arith.constant 1 : index
    %c0_17 = arith.constant 0 : index
    %3 = vector.load %arg2[%c0_13, %c0_14, %c0_15, %c1_16, %c0_17] : memref<1x2x1x2x16xf32, #tpu.memory_space<vmem>>, vector<1x1x1x1x16xf32>
    tpu.vector_store %arg2[%c0_13, %c0_14, %c0_15, %c1_16, %c0_17], %2 {strides = array<i32>} : memref<1x2x1x2x16xf32, #tpu.memory_space<vmem>>, vector<1x1x1x1x16xf32>,
    %c0_18 = arith.constant 0 : index
    %c1_19 = arith.constant 1 : index
    %c0_20 = arith.constant 0 : index
    %c1_21 = arith.constant 1 : index
    %c0_22 = arith.constant 0 : index
    %4 = vector.load %arg1[%c0_18, %c1_19, %c0_20, %c1_21, %c0_22] : memref<1x2x1x2x16xf32, #tpu.memory_space<vmem>>, vector<1x1x1x1x16xf32>
    %c0_23 = arith.constant 0 : index
    %c1_24 = arith.constant 1 : index
    %c0_25 = arith.constant 0 : index
    %c0_26 = arith.constant 0 : index
    %c0_27 = arith.constant 0 : index
    %5 = vector.load %arg2[%c0_23, %c1_24, %c0_25, %c0_26, %c0_27] : memref<1x2x1x2x16xf32, #tpu.memory_space<vmem>>, vector<1x1x1x1x16xf32>
    tpu.vector_store %arg2[%c0_23, %c1_24, %c0_25, %c0_26, %c0_27], %4 {strides = array<i32>} : memref<1x2x1x2x16xf32, #tpu.memory_space<vmem>>, vector<1x1x1x1x16xf32>,
    %c0_28 = arith.constant 0 : index
    %c1_29 = arith.constant 1 : index
    %c0_30 = arith.constant 0 : index
    %c0_31 = arith.constant 0 : index
    %c0_32 = arith.constant 0 : index
    %6 = vector.load %arg1[%c0_28, %c1_29, %c0_30, %c0_31, %c0_32] : memref<1x2x1x2x16xf32, #tpu.memory_space<vmem>>, vector<1x1x1x1x16xf32>
    %c0_33 = arith.constant 0 : index
    %c1_34 = arith.constant 1 : index
    %c0_35 = arith.constant 0 : index
    %c1_36 = arith.constant 1 : index
    %c0_37 = arith.constant 0 : index
    %7 = vector.load %arg2[%c0_33, %c1_34, %c0_35, %c1_36, %c0_37] : memref<1x2x1x2x16xf32, #tpu.memory_space<vmem>>, vector<1x1x1x1x16xf32>
    tpu.vector_store %arg2[%c0_33, %c1_34, %c0_35, %c1_36, %c0_37], %6 {strides = array<i32>} : memref<1x2x1x2x16xf32, #tpu.memory_space<vmem>>, vector<1x1x1x1x16xf32>,
    return
  }
  func.func @transform_0(%arg0: i32) -> (i32, i32, i32, i32, i32) {
    %c0_i32 = arith.constant 0 : i32
    %c0_i32_0 = arith.constant 0 : i32
    %c0_i32_1 = arith.constant 0 : i32
    %c0_i32_2 = arith.constant 0 : i32
    %c0_i32_3 = arith.constant 0 : i32
    %c0_i32_4 = arith.constant 0 : i32
    return %c0_i32, %c0_i32_0, %c0_i32_1, %c0_i32_2, %c0_i32_3 : i32, i32, i32, i32, i32
  }
  func.func @transform_1(%arg0: i32) -> (i32, i32, i32, i32, i32) {
    %c0_i32 = arith.constant 0 : i32
    %c0_i32_0 = arith.constant 0 : i32
    %c0_i32_1 = arith.constant 0 : i32
    %c0_i32_2 = arith.constant 0 : i32
    %c0_i32_3 = arith.constant 0 : i32
    %c0_i32_4 = arith.constant 0 : i32
    return %c0_i32, %c0_i32_0, %c0_i32_1, %c0_i32_2, %c0_i32_3 : i32, i32, i32, i32, i32
  }
}

</mosaic_0001>

<bundles_post_ra>
// kernel: custom-call.1
= control target key start
LH: loop header
LB: loop body
LE: loop exit
PB: predicated region body
PF: predicated region fallthrough
CT: control target
= control target key end

     0   :  { %s59_s0 = inlined_call_operand.hbm [shape: c64[8,4], index: 0, kind: input, shape index: {}]   ;;  %s60_s1 = inlined_call_operand.vmem [shape: f32[8,4], index: 1, kind: output, shape index: {}]  }
   0x1   :  { %s2_s8 = scalar_lea.hbm %s59_s0, 64 }
   0x2   :  { %3 = vsyncpa [#allocation0], 0  ;;  %s4_s11 = sshll.u32 %s60_s1, 4  ;;  %s34_s14 = scalar_lea.hbm %s59_s0, 128  ;;  %s5_s11 = int_to_ptr.vmem [resolvable:$true] %s4_s11 }
   0x3   :  { %p11_p0 = scmp.ne.s32.totalorder %s2_s8, %s34_s14  ;;  %p13_p1 = scmp.lt.u32.totalorder %s2_s8, %s59_s0 }
   0x4   :  { %p14_p2 = scmp.lt.u32.totalorder %s34_s14, %s34_s14  ;;  %p16_p4 = scmp.lt.u32.totalorder %s34_s14, %s2_s8 }
   0x6   :  { %p15_p3 = por %p14_p2, %p13_p1 }
   0x8   :  { %p17_p5 = por %p16_p4, %p15_p3 }
   0xa   :  { %p18_p6 = pnand %p17_p5, %p11_p0 }
   0xc   :  { %21 = shalt.err (!%p18_p6)  }
   0xd   :  { %s22_s17 = scalar_lea.vmem %s5_s11, 64  ;;  %p27_p8 = scmp.lt.s32.totalorder %s5_s11, %s5_s11 }
   0xe   :  { %p23_p7 = scmp.ne.s32.totalorder %s5_s11, %s22_s17  ;;  %p28_p9 = scmp.lt.s32.totalorder %s22_s17, %s22_s17 }
  0x10   :  { %p29_p10 = por %p28_p9, %p27_p8 }
  0x12   :  { %p30_p11 = pnand %p29_p10, %p23_p7 }
  0x14   :  { %33 = shalt.err (!%p30_p11)  }
  0x15   :  { %7 = dma.hbm_to_vmem [thread:$0]  %s2_s8, 64, %s5_s11, [#allocation0] }
  0x16   :  { %35 = dma.done.wait [#allocation0], 64  }
  0x17   :  { %36 = vsyncadd [#allocation0], 4294967232 }
  0x18   :  { %9 = vsyncpa [#allocation0], 1 }

// kernel: custom-call
= control target key start
LH: loop header
LB: loop body
LE: loop exit
PB: predicated region body
PF: predicated region fallthrough
CT: control target
= control target key end

     0   :  { %2 = vsyncpa [#allocation0], 0  ;;  %s61_s0 = inlined_call_operand.hbm [shape: c64[8,4], index: 0, kind: input, shape index: {}]   ;;  %s62_s1 = inlined_call_operand.vmem [shape: f32[8,4], index: 1, kind: output, shape index: {}]  }
   0x1   :  { %s3_s8 = sshll.u32 %s62_s1, 4  ;;  %s9_s11 = scalar_lea.hbm %s61_s0, 64  ;;  %s4_s8 = int_to_ptr.vmem [resolvable:$true] %s3_s8 }
   0x2   :  { %p10_p0 = scmp.ne.s32.totalorder %s61_s0, %s9_s11  ;;  %s11_s16 = scalar_lea.hbm %s61_s0, 128 }
   0x3   :  { %p12_p1 = scmp.lt.u32.totalorder %s11_s16, %s9_s11  ;;  %p13_p2 = scmp.lt.u32.totalorder %s9_s11, %s61_s0 }
   0x5   :  { %p14_p3 = por %p13_p2, %p12_p1 }
   0x7   :  { %p15_p4 = pnand %p14_p3, %p10_p0 }
   0x9   :  { %18 = shalt.err (!%p15_p4)  }
   0xa   :  { %s19_s1 = scalar_lea.vmem %s4_s8, 64  ;;  %p24_p6 = scmp.lt.s32.totalorder %s4_s8, %s4_s8 }
   0xb   :  { %p20_p5 = scmp.ne.s32.totalorder %s4_s8, %s19_s1  ;;  %p25_p7 = scmp.lt.s32.totalorder %s19_s1, %s19_s1 }
   0xd   :  { %p26_p8 = por %p25_p7, %p24_p6 }
   0xf   :  { %p27_p9 = pnand %p26_p8, %p20_p5 }
  0x11   :  { %30 = shalt.err (!%p27_p9)  }
  0x12   :  { %6 = dma.hbm_to_vmem [thread:$0]  %s61_s0, 64, %s4_s8, [#allocation0] }
  0x13   :  { %31 = dma.done.wait [#allocation0], 64  }
  0x14   :  { %32 = vsyncadd [#allocation0], 4294967232 }
  0x15   :  { %8 = vsyncpa [#allocation0], 1 }

// kernel: custom-call.2
= control target key start
LH: loop header
LB: loop body
LE: loop exit
PB: predicated region body
PF: predicated region fallthrough
CT: control target
= control target key end

     0   :  { %s37_s0 = inlined_call_operand.vmem [shape: f32[8,4], index: 0, kind: input, shape index: {}]   ;;  %s38_s1 = inlined_call_operand.vmem [shape: f32[8,4], index: 1, kind: input, shape index: {}]   ;;  %s39_s2 = inlined_call_operand.vmem [shape: c64[8,4], index: 2, kind: output, shape index: {}]  }
   0x1   :  { %v5_v0 = vld [vmem:[%s37_s0] sm:$0xff] }
   0x2   :  { %v7_v1 = vld [vmem:[%s38_s1] sm:$0xff]  ;;  %6 = vst [vmem:[%s39_s2] sm:$0xff] %v5_v0 }
   0x3   :  { %9 = vst [vmem:[%s39_s2 + $0x8] sm:$0xff] %v7_v1 }

// kernel: cnot_apply_pallas.1
= control target key start
LH: loop header
LB: loop body
LE: loop exit
PB: predicated region body
PF: predicated region fallthrough
CT: control target
= control target key end

     0   :  { %vm9_vm0 = vcmask 122880   ;;  %s61_s0 = inlined_call_operand.vmem [shape: f32[1,2,1,2,16], index: 0, kind: input, shape index: {}]   ;;  %s62_s1 = inlined_call_operand.vmem [shape: f32[1,2,1,2,16], index: 1, kind: output, shape index: {}]  }
   0x1   :  { %v8_v0 = vld [vmem:[%s61_s0] sm:$0x1]  ;;  %v11_v1 = vld [vmem:[%s61_s0 + $0x1] sm:$0x1]  ;;  %v23_v2 = vld [vmem:[%s61_s0 + $0x3] sm:$0x1] }
   0x2   :  { %10 = vst.msk [vmem:[%s62_s1] sm:$0x1] %vm9_vm0, %v8_v0  ;;  %12 = vst.msk [vmem:[%s62_s1 + $0x1] sm:$0x1] %vm9_vm0, %v11_v1  ;;  %v25_v3 = vld [vmem:[%s61_s0 + $0x2] sm:$0x1] }
   0x3   :  { %24 = vst.msk [vmem:[%s62_s1 + $0x2] sm:$0x1] %vm9_vm0, %v23_v2  ;;  %26 = vst.msk [vmem:[%s62_s1 + $0x3] sm:$0x1] %vm9_vm0, %v25_v3 }

</bundles_post_ra>
